<compile_context>
chip_gen: v6e
topology: v6e:2x2x1
jax: 0.10.0
libtpu: 0.0.40
codegen_flags: <defaults>
</compile_context>

<pallas_src>
import functools

import jax
import jax.numpy as jnp
from jax.experimental import pallas as pl
from jax.experimental.pallas import tpu as pltpu

_LN_EPS = 1e-5


def _round_up(x, m):
    return (x + m - 1) // m * m


def _w_offsets(in_dims, fc1_dims, fc2_dims):
    # Row offsets of w2 / w3 inside the packed bf16 weight slab.  16-aligned so
    # static sub-views line up with bf16 (16, 128) tiling.
    off2 = _round_up(in_dims, 16)
    off3 = off2 + _round_up(fc1_dims, 16)
    rows = off3 + _round_up(fc2_dims, 16)
    return off2, off3, rows


def _supports_bf16_act():
    # bf16 EUP/VPU path exists on v6e / v7x; keep f32 activations elsewhere.
    try:
        kind = jax.devices()[0].device_kind.lower()
    except Exception:
        return False
    return ("v6" in kind) or ("v7" in kind)


def _ln_tanh(x, gamma, beta, act_dtype, eps=_LN_EPS):
    # One-pass LayerNorm stats: sum(x) and sum(x*x) are independent cross-lane
    # reductions (overlap on the XLU).  Biased variance + eps matches
    # nn.LayerNorm.  LN math stays f32; the tanh argument is cast to act_dtype
    # (bf16 on v6e/v7x, f32 on v5e).
    inv_n = 1.0 / x.shape[-1]
    s1 = jnp.sum(x, axis=-1, keepdims=True)
    s2 = jnp.sum(x * x, axis=-1, keepdims=True)
    mu = s1 * inv_n
    var = jnp.maximum(s2 * inv_n - mu * mu, 0.0)
    z = (x - mu) * jax.lax.rsqrt(var + eps) * gamma + beta
    return jnp.tanh(z.astype(act_dtype))


def _make_kernel(in_dims, fc1, fc2, out_pad, off2, off3, act_dtype):
    def kernel(x_ref, w_ref, v_ref, o_ref):
        # v_ref rows: 0=b1, 1=g1, 2=be1, 3=b2, 4=g2, 5=be2, 6=b3 (lane-padded).
        def mm(a, w):
            # bf16 x bf16 on the MXU, f32 accumulation.
            return jnp.dot(a.astype(jnp.bfloat16), w,
                           preferred_element_type=jnp.float32)

        # fc1 -> LayerNorm -> tanh
        h = mm(x_ref[...], w_ref[0:in_dims, 0:fc1]) + v_ref[0:1, 0:fc1]
        h = _ln_tanh(h, v_ref[1:2, 0:fc1], v_ref[2:3, 0:fc1], act_dtype)

        # fc2 -> LayerNorm -> tanh
        h = mm(h, w_ref[off2:off2 + fc1, 0:fc2]) + v_ref[3:4, 0:fc2]
        h = _ln_tanh(h, v_ref[4:5, 0:fc2], v_ref[5:6, 0:fc2], act_dtype)

        # out -> tanh (final tanh kept in f32 for output accuracy)
        h = mm(h, w_ref[off3:off3 + fc2, 0:out_pad]) + v_ref[6:7, 0:out_pad]
        o_ref[...] = jnp.tanh(h).astype(o_ref.dtype)

    return kernel


def _choose_blocking(B):
    """Return (block_b, padded_B)."""
    if B <= 256:
        return B, B                       # grid=(1,): tiny-batch latency path
    # >= 2 "parallel" grid steps so both v7x TensorCores get work; block_b is
    # capped at 2048 to stay well inside v5e's default scoped-VMEM limit.
    nsteps = 2 if B <= 4096 else pl.cdiv(B, 2048)
    block_b = _round_up(pl.cdiv(B, nsteps), 8)
    return block_b, block_b * nsteps


@functools.partial(jax.jit, static_argnames=("dims", "use_bf16_act"))
def actor_forward(state, params, *, dims, use_bf16_act=False):
    """state: (B, in_dims) f32. params: dict from init_params(). dims: static tuple."""
    B, in_state = state.shape
    in_dims, fc1, fc2, out_dims = dims
    assert in_state == in_dims
    wslab, vslab = params["w"], params["v"]
    rows, wcols = wslab.shape
    out_pad = _round_up(out_dims, 128)
    off2, off3, _ = _w_offsets(in_dims, fc1, fc2)

    block_b, padded_b = _choose_blocking(B)
    if padded_b != B:
        state = jnp.pad(state, ((0, padded_b - B), (0, 0)))

    act_dtype = jnp.bfloat16 if use_bf16_act else jnp.float32
    kernel = _make_kernel(in_dims, fc1, fc2, out_pad, off2, off3, act_dtype)

    def rep(shape):
        # Replicated (full-array) parameter block, same tile for every grid step.
        return pl.BlockSpec(shape, lambda i: (0, 0))

    out = pl.pallas_call(
        kernel,
        out_shape=jax.ShapeDtypeStruct((padded_b, out_pad), state.dtype),
        grid_spec=pltpu.PrefetchScalarGridSpec(
            num_scalar_prefetch=0,
            grid=(padded_b // block_b,),
            in_specs=[
                pl.BlockSpec((block_b, in_dims), lambda i: (i, 0)),  # state tile
                rep((rows, wcols)),   # packed bf16 weights [w1; w2; w3]
                rep((7, wcols)),      # packed f32 vectors [b1,g1,be1,b2,g2,be2,b3]
            ],
            out_specs=pl.BlockSpec((block_b, out_pad), lambda i: (i, 0)),
        ),
        # VMEM footprint at block_b<=2048 is a few MiB -> default scoped-VMEM
        # limits are ample on every generation; no vmem_limit_bytes needed.
        compiler_params=pltpu.CompilerParams(
            dimension_semantics=("parallel",)),
    )(state, wslab, vslab)

    # Strip lane padding (out_pad -> out_dims) and any batch padding.
    return out[:B, :out_dims]


def init_params(key, in_dims, fc1_dims, fc2_dims, out_dims):
    ks = jax.random.split(key, 6)

    def linear(kw, kb, fan_in, fan_out):
        # PyTorch nn.Linear default init: U(-1/sqrt(fan_in), 1/sqrt(fan_in)).
        bound = 1.0 / float(fan_in) ** 0.5
        w = jax.random.uniform(kw, (fan_in, fan_out), jnp.float32, -bound, bound)
        b = jax.random.uniform(kb, (fan_out,), jnp.float32, -bound, bound)
        return w, b

    w1, b1 = linear(ks[0], ks[1], in_dims, fc1_dims)
    w2, b2 = linear(ks[2], ks[3], fc1_dims, fc2_dims)
    w3, b3 = linear(ks[4], ks[5], fc2_dims, out_dims)

    out_pad = _round_up(out_dims, 128)
    wcols = _round_up(max(fc1_dims, fc2_dims, out_pad), 128)
    off2, off3, rows = _w_offsets(in_dims, fc1_dims, fc2_dims)

    # Packed bf16 weight slab (zero-padded columns -> lane-dense, unmasked out).
    wslab = jnp.zeros((rows, wcols), jnp.float32)
    wslab = wslab.at[0:in_dims, 0:fc1_dims].set(w1)
    wslab = wslab.at[off2:off2 + fc1_dims, 0:fc2_dims].set(w2)
    wslab = wslab.at[off3:off3 + fc2_dims, 0:out_dims].set(w3)

    # Packed f32 vector slab: rows = b1, g1, be1, b2, g2, be2, b3.
    # LayerNorm defaults: gamma=1, beta=0.
    vslab = jnp.zeros((7, wcols), jnp.float32)
    vslab = vslab.at[0, 0:fc1_dims].set(b1)
    vslab = vslab.at[1, 0:fc1_dims].set(1.0)
    vslab = vslab.at[3, 0:fc2_dims].set(b2)
    vslab = vslab.at[4, 0:fc2_dims].set(1.0)
    vslab = vslab.at[6, 0:out_dims].set(b3)

    params = {"w": wslab.astype(jnp.bfloat16), "v": vslab}
    dims = (in_dims, fc1_dims, fc2_dims, out_dims)
    return params, dims


def actor_forward_ref(state, params, dims, use_bf16_act=False):
    # Pure-JAX reference mirroring the kernel math (bf16 matmul operands, f32
    # accumulation, one-pass LayerNorm, act-dtype tanh).
    in_dims, fc1, fc2, out_dims = dims
    w, v = params["w"], params["v"]
    off2, off3, _ = _w_offsets(in_dims, fc1, fc2)
    act_dtype = jnp.bfloat16 if use_bf16_act else jnp.float32

    def mm(a, ws):
        return jnp.dot(a.astype(jnp.bfloat16), ws,
                       preferred_element_type=jnp.float32)

    h = mm(state, w[0:in_dims, 0:fc1]) + v[0:1, 0:fc1]
    h = _ln_tanh(h, v[1:2, 0:fc1], v[2:3, 0:fc1], act_dtype)
    h = mm(h, w[off2:off2 + fc1, 0:fc2]) + v[3:4, 0:fc2]
    h = _ln_tanh(h, v[4:5, 0:fc2], v[5:6, 0:fc2], act_dtype)
    h = mm(h, w[off3:off3 + fc2, 0:out_dims]) + v[6:7, 0:out_dims]
    return jnp.tanh(h)


if __name__ == "__main__":
    # Small, forward-implied shapes: in_dims=16, hidden1=64, hidden2=64, out=8.
    in_dims, fc1_dims, fc2_dims, out_dims = 16, 64, 64, 8

    key = jax.random.PRNGKey(0)
    k_state, k_params, k_state2 = jax.random.split(key, 3)
    params, dims = init_params(k_params, in_dims, fc1_dims, fc2_dims, out_dims)
    use_bf16_act = _supports_bf16_act()

    # 1) Tiny inference batch -> grid=(1,) latency path.
    B = 16
    state = jax.random.normal(k_state, (B, in_dims), jnp.float32)
    out = actor_forward(state, params, dims=dims, use_bf16_act=use_bf16_act)
    out = jax.block_until_ready(out)
    ref = actor_forward_ref(state, params, dims, use_bf16_act=use_bf16_act)
    assert out.shape == (B, out_dims)
    err = float(jnp.max(jnp.abs(out - ref)))
    assert err < 2e-3, f"small-batch mismatch vs reference: {err}"

    # 2) Ragged medium batch -> 2 parallel grid steps + row padding path.
    B2 = 600
    state2 = jax.random.normal(k_state2, (B2, in_dims), jnp.float32)
    out2 = actor_forward(state2, params, dims=dims, use_bf16_act=use_bf16_act)
    out2 = jax.block_until_ready(out2)
    ref2 = actor_forward_ref(state2, params, dims, use_bf16_act=use_bf16_act)
    assert out2.shape == (B2, out_dims)
    err2 = float(jnp.max(jnp.abs(out2 - ref2)))
    assert err2 < 2e-3, f"medium-batch mismatch vs reference: {err2}"

    print("KERNEL_OK")
</pallas_src>

<mosaic_0001>
module attributes {stable_mosaic.version = 11 : i64} {
  func.func @kernel(%arg0: i32, %arg1: memref<16x16xf32, #tpu.memory_space<vmem>>, %arg2: memref<144x128xbf16, #tpu.memory_space<vmem>>, %arg3: memref<7x128xf32, #tpu.memory_space<vmem>>, %arg4: memref<16x128xf32, #tpu.memory_space<vmem>>) attributes {dimension_semantics = [#tpu.dimension_semantics<parallel>], iteration_bounds = array<i64: 1>, scalar_prefetch = 0 : i64, scratch_operands = 0 : i64, tpu.core_type = #tpu.core_type<tc>, window_params = [{transform_indices = @transform_0, window_bounds = array<i64: 16, 16>}, {pipeline_mode = #tpu.pipeline_mode<synchronous>, transform_indices = @transform_1, window_bounds = array<i64: 144, 128>}, {pipeline_mode = #tpu.pipeline_mode<synchronous>, transform_indices = @transform_2, window_bounds = array<i64: 7, 128>}, {transform_indices = @transform_3, window_bounds = array<i64: 16, 128>}]} {
    %c0 = arith.constant 0 : index
    %c0_0 = arith.constant 0 : index
    %0 = vector.load %arg1[%c0, %c0_0] : memref<16x16xf32, #tpu.memory_space<vmem>>, vector<16x16xf32>
    %c0_1 = arith.constant 0 : index
    %c0_2 = arith.constant 0 : index
    %1 = vector.load %arg2[%c0_1, %c0_2] : memref<144x128xbf16, #tpu.memory_space<vmem>>, vector<16x64xbf16>
    %2 = arith.truncf %0 : vector<16x16xf32> to vector<16x16xbf16>
    %cst = arith.constant dense<0.000000e+00> : vector<16x64xf32>
    %3 = tpu.matmul %2, %1, %cst {dimension_numbers = #tpu.dot_dimension_numbers<[1], [0], [0], [1], [0, 0, 1, 1], [], []>} : vector<16x16xbf16>, vector<16x64xbf16>, vector<16x64xf32> -> vector<16x64xf32>
    %c0_3 = arith.constant 0 : index
    %c0_4 = arith.constant 0 : index
    %4 = vector.load %arg3[%c0_3, %c0_4] : memref<7x128xf32, #tpu.memory_space<vmem>>, vector<1x64xf32>
    %5 = vector.broadcast %4 : vector<1x64xf32> to vector<16x64xf32>
    %6 = arith.addf %3, %5 : vector<16x64xf32>
    %c1 = arith.constant 1 : index
    %c0_5 = arith.constant 0 : index
    %7 = vector.load %arg3[%c1, %c0_5] : memref<7x128xf32, #tpu.memory_space<vmem>>, vector<1x64xf32>
    %c2 = arith.constant 2 : index
    %c0_6 = arith.constant 0 : index
    %8 = vector.load %arg3[%c2, %c0_6] : memref<7x128xf32, #tpu.memory_space<vmem>>, vector<1x64xf32>
    %cst_7 = arith.constant dense<0.000000e+00> : vector<16xf32>
    %9 = vector.multi_reduction <add>, %6, %cst_7 [1] : vector<16x64xf32> to vector<16xf32>
    %10 = vector.shape_cast %9 : vector<16xf32> to vector<16x1xf32>
    %11 = arith.mulf %6, %6 : vector<16x64xf32>
    %cst_8 = arith.constant dense<0.000000e+00> : vector<16xf32>
    %12 = vector.multi_reduction <add>, %11, %cst_8 [1] : vector<16x64xf32> to vector<16xf32>
    %13 = vector.shape_cast %12 : vector<16xf32> to vector<16x1xf32>
    %cst_9 = arith.constant 1.562500e-02 : f32
    %14 = vector.broadcast %cst_9 : f32 to vector<16x1xf32>
    %15 = arith.mulf %10, %14 : vector<16x1xf32>
    %cst_10 = arith.constant 1.562500e-02 : f32
    %16 = vector.broadcast %cst_10 : f32 to vector<16x1xf32>
    %17 = arith.mulf %13, %16 : vector<16x1xf32>
    %18 = arith.mulf %15, %15 : vector<16x1xf32>
    %19 = arith.subf %17, %18 : vector<16x1xf32>
    %cst_11 = arith.constant 0.000000e+00 : f32
    %20 = vector.broadcast %cst_11 : f32 to vector<16x1xf32>
    %21 = arith.maximumf %19, %20 : vector<16x1xf32>
    %22 = vector.broadcast %15 : vector<16x1xf32> to vector<16x64xf32>
    %23 = arith.subf %6, %22 : vector<16x64xf32>
    %cst_12 = arith.constant 9.99999974E-6 : f32
    %24 = vector.broadcast %cst_12 : f32 to vector<16x1xf32>
    %25 = arith.addf %21, %24 : vector<16x1xf32>
    %26 = math.rsqrt %25 : vector<16x1xf32>
    %27 = vector.broadcast %26 : vector<16x1xf32> to vector<16x64xf32>
    %28 = arith.mulf %23, %27 : vector<16x64xf32>
    %29 = vector.broadcast %7 : vector<1x64xf32> to vector<16x64xf32>
    %30 = arith.mulf %28, %29 : vector<16x64xf32>
    %31 = vector.broadcast %8 : vector<1x64xf32> to vector<16x64xf32>
    %32 = arith.addf %30, %31 : vector<16x64xf32>
    %33 = math.tanh %32 : vector<16x64xf32>
    %c16 = arith.constant 16 : index
    %c0_13 = arith.constant 0 : index
    %34 = vector.load %arg2[%c16, %c0_13] : memref<144x128xbf16, #tpu.memory_space<vmem>>, vector<64x64xbf16>
    %35 = arith.truncf %33 : vector<16x64xf32> to vector<16x64xbf16>
    %cst_14 = arith.constant dense<0.000000e+00> : vector<16x64xf32>
    %36 = tpu.matmul %35, %34, %cst_14 {dimension_numbers = #tpu.dot_dimension_numbers<[1], [0], [0], [1], [0, 0, 1, 1], [], []>} : vector<16x64xbf16>, vector<64x64xbf16>, vector<16x64xf32> -> vector<16x64xf32>
    %c3 = arith.constant 3 : index
    %c0_15 = arith.constant 0 : index
    %37 = vector.load %arg3[%c3, %c0_15] : memref<7x128xf32, #tpu.memory_space<vmem>>, vector<1x64xf32>
    %38 = vector.broadcast %37 : vector<1x64xf32> to vector<16x64xf32>
    %39 = arith.addf %36, %38 : vector<16x64xf32>
    %c4 = arith.constant 4 : index
    %c0_16 = arith.constant 0 : index
    %40 = vector.load %arg3[%c4, %c0_16] : memref<7x128xf32, #tpu.memory_space<vmem>>, vector<1x64xf32>
    %c5 = arith.constant 5 : index
    %c0_17 = arith.constant 0 : index
    %41 = vector.load %arg3[%c5, %c0_17] : memref<7x128xf32, #tpu.memory_space<vmem>>, vector<1x64xf32>
    %cst_18 = arith.constant dense<0.000000e+00> : vector<16xf32>
    %42 = vector.multi_reduction <add>, %39, %cst_18 [1] : vector<16x64xf32> to vector<16xf32>
    %43 = vector.shape_cast %42 : vector<16xf32> to vector<16x1xf32>
    %44 = arith.mulf %39, %39 : vector<16x64xf32>
    %cst_19 = arith.constant dense<0.000000e+00> : vector<16xf32>
    %45 = vector.multi_reduction <add>, %44, %cst_19 [1] : vector<16x64xf32> to vector<16xf32>
    %46 = vector.shape_cast %45 : vector<16xf32> to vector<16x1xf32>
    %cst_20 = arith.constant 1.562500e-02 : f32
    %47 = vector.broadcast %cst_20 : f32 to vector<16x1xf32>
    %48 = arith.mulf %43, %47 : vector<16x1xf32>
    %cst_21 = arith.constant 1.562500e-02 : f32
    %49 = vector.broadcast %cst_21 : f32 to vector<16x1xf32>
    %50 = arith.mulf %46, %49 : vector<16x1xf32>
    %51 = arith.mulf %48, %48 : vector<16x1xf32>
    %52 = arith.subf %50, %51 : vector<16x1xf32>
    %cst_22 = arith.constant 0.000000e+00 : f32
    %53 = vector.broadcast %cst_22 : f32 to vector<16x1xf32>
    %54 = arith.maximumf %52, %53 : vector<16x1xf32>
    %55 = vector.broadcast %48 : vector<16x1xf32> to vector<16x64xf32>
    %56 = arith.subf %39, %55 : vector<16x64xf32>
    %cst_23 = arith.constant 9.99999974E-6 : f32
    %57 = vector.broadcast %cst_23 : f32 to vector<16x1xf32>
    %58 = arith.addf %54, %57 : vector<16x1xf32>
    %59 = math.rsqrt %58 : vector<16x1xf32>
    %60 = vector.broadcast %59 : vector<16x1xf32> to vector<16x64xf32>
    %61 = arith.mulf %56, %60 : vector<16x64xf32>
    %62 = vector.broadcast %40 : vector<1x64xf32> to vector<16x64xf32>
    %63 = arith.mulf %61, %62 : vector<16x64xf32>
    %64 = vector.broadcast %41 : vector<1x64xf32> to vector<16x64xf32>
    %65 = arith.addf %63, %64 : vector<16x64xf32>
    %66 = math.tanh %65 : vector<16x64xf32>
    %c80 = arith.constant 80 : index
    %c0_24 = arith.constant 0 : index
    %67 = vector.load %arg2[%c80, %c0_24] : memref<144x128xbf16, #tpu.memory_space<vmem>>, vector<64x128xbf16>
    %68 = arith.truncf %66 : vector<16x64xf32> to vector<16x64xbf16>
    %cst_25 = arith.constant dense<0.000000e+00> : vector<16x128xf32>
    %69 = tpu.matmul %68, %67, %cst_25 {dimension_numbers = #tpu.dot_dimension_numbers<[1], [0], [0], [1], [0, 0, 1, 1], [], []>} : vector<16x64xbf16>, vector<64x128xbf16>, vector<16x128xf32> -> vector<16x128xf32>
    %c6 = arith.constant 6 : index
    %c0_26 = arith.constant 0 : index
    %70 = vector.load %arg3[%c6, %c0_26] : memref<7x128xf32, #tpu.memory_space<vmem>>, vector<1x128xf32>
    %71 = vector.broadcast %70 : vector<1x128xf32> to vector<16x128xf32>
    %72 = arith.addf %69, %71 : vector<16x128xf32>
    %73 = math.tanh %72 : vector<16x128xf32>
    %c0_27 = arith.constant 0 : index
    %c0_28 = arith.constant 0 : index
    %74 = vector.load %arg4[%c0_27, %c0_28] : memref<16x128xf32, #tpu.memory_space<vmem>>, vector<16x128xf32>
    tpu.vector_store %arg4[%c0_27, %c0_28], %73 {strides = array<i32>} : memref<16x128xf32, #tpu.memory_space<vmem>>, vector<16x128xf32>,
    return
  }
  func.func @transform_0(%arg0: i32) -> (i32, i32) {
    %c0_i32 = arith.constant 0 : i32
    %c0_i32_0 = arith.constant 0 : i32
    return %arg0, %c0_i32 : i32, i32
  }
  func.func @transform_1(%arg0: i32) -> (i32, i32) {
    %c0_i32 = arith.constant 0 : i32
    %c0_i32_0 = arith.constant 0 : i32
    %c0_i32_1 = arith.constant 0 : i32
    return %c0_i32, %c0_i32_0 : i32, i32
  }
  func.func @transform_2(%arg0: i32) -> (i32, i32) {
    %c0_i32 = arith.constant 0 : i32
    %c0_i32_0 = arith.constant 0 : i32
    %c0_i32_1 = arith.constant 0 : i32
    return %c0_i32, %c0_i32_0 : i32, i32
  }
  func.func @transform_3(%arg0: i32) -> (i32, i32) {
    %c0_i32 = arith.constant 0 : i32
    %c0_i32_0 = arith.constant 0 : i32
    return %arg0, %c0_i32 : i32, i32
  }
}

</mosaic_0001>

<bundles_post_ra>
// kernel: actor_forward.1
= control target key start
LH: loop header
LB: loop body
LE: loop exit
PB: predicated region body
PF: predicated region fallthrough
CT: control target
= control target key end

     0   :  { %8 = vsyncpa [#allocation3], 0  ;;  %s615_s0 = inlined_call_operand.hbm [shape: f32[16,16], index: 0, kind: input, shape index: {}]   ;;  %s616_s1 = inlined_call_operand.hbm [shape: bf16[144,128], index: 1, kind: input, shape index: {}]   ;;  %s617_s2 = inlined_call_operand.hbm [shape: f32[7,128], index: 2, kind: input, shape index: {}]   ;;  %s618_s3 = inlined_call_operand.vmem [shape: f32[16,128], index: 3, kind: output, shape index: {}]  }
   0x1   :  { %9 = vsyncpa [#allocation5], 0  ;;  %s549_s12 = smov [#allocation4]  }
   0x2   :  { %s27_s13 = sshll.u32 %s549_s12, 4  ;;  %s28_s13 = int_to_ptr.vmem [resolvable:$true] %s27_s13 }
   0x3   :  { %s493_s14 = scalar_lea.vmem %s28_s13, 1152  ;;  %p498_p1 = scmp.lt.s32.totalorder %s28_s13, %s28_s13 }
   0x4   :  { %p494_p0 = scmp.ne.s32.totalorder %s28_s13, %s493_s14  ;;  %p499_p2 = scmp.lt.s32.totalorder %s493_s14, %s493_s14 }
   0x6   :  { %p500_p3 = por %p499_p2, %p498_p1 }
   0x8   :  { %p501_p4 = pnand %p500_p3, %p494_p0 }
   0xa   :  { %504 = shalt.err (!%p501_p4)
}
   0xb   :  { %s550_s15 = smov 64   ;;  %s551_s16 = smov 4  }
   0xc   :  { %33 = dma.hbm_to_vmem [thread:$0]  %s616_s1, 1152, %s28_s13, [#allocation5], %s550_s15, %s550_s15, %s551_s16  }
   0xd   :  { %s552_s19 = smov [#allocation2]  }
   0xe   :  { %s15_s20 = sshll.u32 %s552_s19, 4  ;;  %s16_s20 = int_to_ptr.vmem [resolvable:$true] %s15_s20 }
   0xf   :  { %s513_s21 = scalar_lea.vmem %s16_s20, 256  ;;  %p518_p6 = scmp.lt.s32.totalorder %s16_s20, %s16_s20 }
  0x10   :  { %p514_p5 = scmp.ne.s32.totalorder %s16_s20, %s513_s21  ;;  %p519_p7 = scmp.lt.s32.totalorder %s513_s21, %s513_s21 }
  0x12   :  { %p520_p8 = por %p519_p7, %p518_p6 }
  0x14   :  { %p521_p9 = pnand %p520_p8, %p514_p5 }
  0x16   :  { %524 = shalt.err (!%p521_p9)
}
  0x17   :  { %s553_s22 = smov 128   ;;  %s554_s23 = smov 8  }
  0x18   :  { %21 = dma.hbm_to_vmem [thread:$0]  %s615_s0, 256, %s16_s20, [#allocation3], %s553_s22, %s553_s22, %s554_s23  }
  0x19   :  { %s555_s26 = smov [#allocation6]  }
  0x1a   :  { %s40_s27 = sshll.u32 %s555_s26, 4  ;;  %s41_s27 = int_to_ptr.vmem [resolvable:$true] %s40_s27 }
  0x1b   :  { %s533_s1 = scalar_lea.vmem %s41_s27, 128  ;;  %p538_p11 = scmp.lt.s32.totalorder %s41_s27, %s41_s27 }
  0x1c   :  { %p534_p10 = scmp.ne.s32.totalorder %s41_s27, %s533_s1  ;;  %p539_p12 = scmp.lt.s32.totalorder %s533_s1, %s533_s1 }
  0x1e   :  { %p540_p13 = por %p539_p12, %p538_p11 }
  0x20   :  { %p541_p0 = pnand %p540_p13, %p534_p10 }
  0x22   :  { %544 = shalt.err (!%p541_p0)
}
  0x23   :  { %43 = dma.hbm_to_vmem [thread:$0]  %s617_s2, 128, %s41_s27, [#allocation5]  }
  0x24   :  { %545 = dma.done.wait [#allocation3], 256  }
  0x25   :  { %546 = vsyncadd [#allocation3], 4294967040 }
  0x26   :  { %547 = dma.done.wait [#allocation5], 1280  }
  0x27   :  { %548 = vsyncadd [#allocation5], 4294966016  ;;  %v556_v0 = vmov 0.0   ;;  %vm557_vm0 = vmmov 0   ;;  %v456_v1 = vld [vmem:[#allocation4] sm:$0xff]   ;;  %v54_v2 = vld [vmem:[#allocation2] sm:$0xff] }
  0x28   :  { %417 = vmatprep.subr.bf16.mxu0 %v556_v0  ;;  %419 = vmatprep.mubr.msk.bf16.mxu0 %vm557_vm0, %v556_v0  ;;  %v55_v3 = vld [vmem:[#allocation2 + $0x8] sm:$0xff]  ;;  %vm70_vm1 = vcmask 130048   ;;  %v386_v5 = vld [vmem:[#allocation6] ss:$0 sm:$0xff]  ;;  %vm117_vm2 = vcmask 523264   ;;  %v457_v18 = vld [vmem:[#allocation4 + $0x20] sm:$0xff]  }
  0x29   :  { %423 = vmatprep.subr.bf16.mxu1 %v556_v0  ;;  %431 = vmatprep.mubr.msk.bf16.mxu1 %vm557_vm0, %v556_v0  ;;  %v58_v4 = vpack.c.bf16 %v55_v3, %v54_v2  ;;  %v458_v19 = vld [vmem:[#allocation4 + $0x18] sm:$0xff]   ;;  %v459_v20 = vld [vmem:[#allocation4 + $0x10] sm:$0xff]   ;;  %v460_v21 = vld [vmem:[#allocation4 + $0x8] sm:$0xff]  }
  0x2a   :  { %418 = vmatpush3.bf16.msra.mxu0 %v456_v1  ;;  %424 = vmatpush3.bf16.msra.mxu1 %v457_v18  ;;  %v389_v40 = vld [vmem:[#allocation6 + $0x1] ss:$0 sm:$0xff]  ;;  %v390_v44 = vld [vmem:[#allocation6 + $0x2] ss:$0 sm:$0xff]  ;;  %v391_v53 = vld [vmem:[#allocation6 + $0x3] ss:$0 sm:$0xff] }
  0x2b   :  { %435 = vmatprep.subr.bf16.mxu0 %v556_v0  ;;  %425 = vmatprep.subr.bf16.mxu1 %v556_v0  ;;  %v461_v3 = vld [vmem:[#allocation4 + $0x40] sm:$0xff]  }
  0x2d   :  { %420 = vmatmul.mubr.msk.bf16.vlgmr.msra.gmra.mxu0 %vm70_vm1, %v58_v4  ;;  %v462_v4 = vld [vmem:[#allocation4 + $0x38] sm:$0xff]  }
  0x2e   :  { %443 = vmatprep.mubr.msk.bf16.mxu0 %vm557_vm0, %v556_v0  ;;  %426 = vmatpush3.bf16.msra.mxu1 %v458_v19 }
  0x2f   :  { %427 = vmatprep.subr.bf16.mxu1 %v556_v0  ;;  %436 = vmatpush3.bf16.msra.mxu0 %v461_v3 }
  0x30   :  { %437 = vmatprep.subr.bf16.mxu0 %v556_v0 }
  0x32   :  { %428 = vmatpush3.bf16.msra.mxu1 %v459_v20 }
  0x33   :  { %429 = vmatprep.subr.bf16.mxu1 %v556_v0  ;;  %438 = vmatpush3.bf16.msra.mxu0 %v462_v4 }
  0x34   :  { %439 = vmatprep.subr.bf16.mxu0 %v556_v0 }
  0x36   :  { %430 = vmatpush3.bf16.msra.mxu1 %v460_v21 }
  0xed   :  { %v108_v6 = vpop.f32.mrf.mxu0 }
  0xee   :  { %v109_v7 = vadd.f32 %v386_v5, %v108_v6  ;;  %v464_v6 = vld [vmem:[#allocation4 + $0x28] sm:$0xff]  }
  0xef   :  { %v421_v8 = vpop.f32.mrf.mxu0 }
  0xf0   :  { %v118_v9 = vsel %vm117_vm2, %v109_v7, 0.0  ;;  %v124_v10 = vmul.f32 %v109_v7, %v109_v7 }
  0xf1   :  { %119 = vadd.xlane.f32.xlu0 %v118_v9  ;;  %v111_v11 = vpop.f32.mrf.mxu0 }
  0xf2   :  { %v112_v12 = vadd.f32 %v386_v5, %v111_v11  ;;  %v126_v13 = vsel %vm117_vm2, %v124_v10, 0.0  ;;  %v463_v5 = vld [vmem:[#allocation4 + $0x30] sm:$0xff]  }
  0xf3   :  { %127 = vadd.xlane.f32.xlu1 %v126_v13  ;;  %v422_v14 = vpop.f32.mrf.mxu0  ;;  %440 = vmatpush3.bf16.msra.mxu0 %v463_v5 }
  0xf4   :  { %v121_v15 = vsel %vm117_vm2, %v112_v12, 0.0  ;;  %v125_v16 = vmul.f32 %v112_v12, %v112_v12  ;;  %441 = vmatprep.subr.bf16.mxu0 %v556_v0 }
  0xf5   :  { %122 = vadd.xlane.f32.xlu0 %v121_v15 }
  0xf6   :  { %v129_v17 = vsel %vm117_vm2, %v125_v16, 0.0 }
  0xf7   :  { %130 = vadd.xlane.f32.xlu1 %v129_v17  ;;  %442 = vmatpush3.bf16.msra.mxu0 %v464_v6 }
 0x17a   :  { %v120_v22 = vpop.xlane.xlu0 %119 }
 0x17b   :  { %v132_v23 = vmul.f32 0.015625, %v120_v22 }
 0x17c   :  { %v128_v24 = vpop.xlane.xlu1 %127 }
 0x17d   :  { %v136_v25 = vmul.f32 %v132_v23, %v132_v23  ;;  %v134_v26 = vmul.f32 0.015625, %v128_v24  ;;  %v142_v38 = vsub.f32 %v109_v7, %v132_v23  ;;  %v397_v24 = vld [vmem:[#allocation6 + $0x4] ss:$0 sm:$0xff] }
 0x17e   :  { %v123_v27 = vpop.xlane.xlu0 %122 }
 0x17f   :  { %v138_v28 = vsub.f32 %v134_v26, %v136_v25  ;;  %v133_v29 = vmul.f32 0.015625, %v123_v27  ;;  %v398_v26 = vld [vmem:[#allocation6 + $0x5] ss:$0 sm:$0xff] }
 0x180   :  { %v131_v30 = vpop.xlane.xlu1 %130 }
 0x181   :  { %v140_v31 = vmax.f32 %v138_v28, 0.0  ;;  %v137_v32 = vmul.f32 %v133_v29, %v133_v29  ;;  %v135_v33 = vmul.f32 0.015625, %v131_v30  ;;  %v143_v43 = vsub.f32 %v112_v12, %v133_v29 }
 0x183   :  { %v144_v34 = vadd.f32 1e-05, %v140_v31  ;;  %v139_v35 = vsub.f32 %v135_v33, %v137_v32 }
 0x185   :  { %465 = vrsqrt.f32 %v144_v34  ;;  %v141_v36 = vmax.f32 %v139_v35, 0.0 }
 0x187   :  { %v145_v37 = vadd.f32 1e-05, %v141_v36 }
 0x189   :  { %467 = vrsqrt.f32 %v145_v37  ;;  %v399_v37 = vld [vmem:[#allocation6 + $0x6] ss:$0 sm:$0xff] }
 0x192   :  { %v466_v39 = vpop.eup %465 }
 0x193   :  { %v148_v41 = vmul.f32 %v466_v39, %v142_v38 }
 0x195   :  { %v154_v42 = vmul.f32 %v389_v40, %v148_v41 }
 0x196   :  { %v468_v45 = vpop.eup %467 }
 0x197   :  { %v149_v46 = vmul.f32 %v468_v45, %v143_v43  ;;  %v160_v47 = vadd.f32 %v390_v44, %v154_v42 }
 0x199   :  { %v155_v48 = vmul.f32 %v389_v40, %v149_v46  ;;  %469 = vtanh.f32 %v160_v47 }
 0x19b   :  { %v161_v49 = vadd.f32 %v390_v44, %v155_v48 }
 0x19d   :  { %471 = vtanh.f32 %v161_v49 }
 0x1a6   :  { %v470_v50 = vpop.eup %469 }
 0x1aa   :  { %v472_v51 = vpop.eup %471 }
 0x1ab   :  { %v172_v52 = vpack.c.bf16 %v472_v51, %v470_v50 }
 0x1ad   :  { %432 = vmatmul.mubr.msk.bf16.vlgmr.msra.gmra.mxu1 %vm117_vm2, %v172_v52 }
 0x26d   :  { %v239_v54 = vpop.f32.mrf.mxu1 }
 0x26e   :  { %v240_v55 = vadd.f32 %v391_v53, %v239_v54 }
 0x26f   :  { %v433_v56 = vpop.f32.mrf.mxu1 }
 0x270   :  { %v248_v57 = vsel %vm117_vm2, %v240_v55, 0.0  ;;  %v254_v58 = vmul.f32 %v240_v55, %v240_v55 }
 0x271   :  { %249 = vadd.xlane.f32.xlu0 %v248_v57  ;;  %v242_v59 = vpop.f32.mrf.mxu1 }
 0x272   :  { %v243_v60 = vadd.f32 %v391_v53, %v242_v59  ;;  %v256_v62 = vsel %vm117_vm2, %v254_v58, 0.0 }
 0x273   :  { %v434_v61 = vpop.f32.mrf.mxu1 }
 0x274   :  { %v251_v63 = vsel %vm117_vm2, %v243_v60, 0.0  ;;  %v255_v1 = vmul.f32 %v243_v60, %v243_v60 }
 0x275   :  { %257 = vadd.xlane.f32.xlu0 %v256_v62  ;;  %252 = vadd.xlane.f32.xlu1 %v251_v63 }
 0x276   :  { %v259_v2 = vsel %vm117_vm2, %v255_v1, 0.0 }
 0x279   :  { %260 = vadd.xlane.f32.xlu1 %v259_v2 }
 0x2fa   :  { %v250_v7 = vpop.xlane.xlu0 %249 }
 0x2fb   :  { %v262_v8 = vmul.f32 0.015625, %v250_v7 }
 0x2fd   :  { %v266_v11 = vmul.f32 %v262_v8, %v262_v8  ;;  %v272_v0 = vsub.f32 %v240_v55, %v262_v8 }
 0x2fe   :  { %v258_v9 = vpop.xlane.xlu0 %257  ;;  %v253_v10 = vpop.xlane.xlu1 %252 }
 0x2ff   :  { %v264_v12 = vmul.f32 0.015625, %v258_v9  ;;  %v263_v13 = vmul.f32 0.015625, %v253_v10 }
 0x301   :  { %v268_v14 = vsub.f32 %v264_v12, %v266_v11  ;;  %v267_v17 = vmul.f32 %v263_v13, %v263_v13  ;;  %v273_v28 = vsub.f32 %v243_v60, %v263_v13 }
 0x302   :  { %v261_v15 = vpop.xlane.xlu1 %260 }
 0x303   :  { %v270_v16 = vmax.f32 %v268_v14, 0.0  ;;  %v265_v18 = vmul.f32 0.015625, %v261_v15 }
 0x305   :  { %v274_v19 = vadd.f32 1e-05, %v270_v16  ;;  %v269_v20 = vsub.f32 %v265_v18, %v267_v17 }
 0x307   :  { %473 = vrsqrt.f32 %v274_v19  ;;  %v271_v21 = vmax.f32 %v269_v20, 0.0 }
 0x309   :  { %v275_v22 = vadd.f32 1e-05, %v271_v21 }
 0x30b   :  { %475 = vrsqrt.f32 %v275_v22 }
 0x314   :  { %v474_v23 = vpop.eup %473 }
 0x315   :  { %v278_v25 = vmul.f32 %v474_v23, %v272_v0 }
 0x317   :  { %v284_v27 = vmul.f32 %v397_v24, %v278_v25 }
 0x318   :  { %v476_v29 = vpop.eup %475 }
 0x319   :  { %v279_v30 = vmul.f32 %v476_v29, %v273_v28  ;;  %v290_v31 = vadd.f32 %v398_v26, %v284_v27 }
 0x31b   :  { %v285_v32 = vmul.f32 %v397_v24, %v279_v30  ;;  %477 = vtanh.f32 %v290_v31 }
 0x31d   :  { %v291_v33 = vadd.f32 %v398_v26, %v285_v32 }
 0x31f   :  { %479 = vtanh.f32 %v291_v33 }
 0x328   :  { %v478_v34 = vpop.eup %477 }
 0x32c   :  { %v480_v35 = vpop.eup %479 }
 0x32d   :  { %v302_v36 = vpack.c.bf16 %v480_v35, %v478_v34 }
 0x32f   :  { %444 = vmatmul.mubr.msk.bf16.vlgmr.msra.gmra.mxu0 %vm117_vm2, %v302_v36 }
 0x3ef   :  { %v369_v38 = vpop.f32.mrf.mxu0 }
 0x3f0   :  { %v370_v39 = vadd.f32 %v399_v37, %v369_v38 }
 0x3f1   :  { %v445_v40 = vpop.f32.mrf.mxu0 }
 0x3f2   :  { %481 = vtanh.f32 %v370_v39 }
 0x3f3   :  { %v372_v41 = vpop.f32.mrf.mxu0 }
 0x3f4   :  { %v373_v42 = vadd.f32 %v399_v37, %v372_v41 }
 0x3f5   :  { %v446_v43 = vpop.f32.mrf.mxu0 }
 0x3f6   :  { %483 = vtanh.f32 %v373_v42 }
 0x3ff   :  { %v482_v44 = vpop.eup %481 }
 0x400   :  { %378 = vst [vmem:[%s618_s3] sm:$0xff] %v482_v44 }
 0x403   :  { %v484_v45 = vpop.eup %483 }
 0x404   :  { %379 = vst [vmem:[%s618_s3 + $0x8] sm:$0xff] %v484_v45 }
 0x405   :  { %384 = vsyncpa [#allocation3], 1 }
 0x406   :  { %385 = vsyncpa [#allocation5], 1 }

</bundles_post_ra>
